<compile_context>
chip_gen: v7x
topology: tpu7x:2x2x1
jax: 0.10.0
libtpu: 0.0.40
codegen_flags: <defaults>
</compile_context>

<pallas_src>
import functools

import jax
import jax.numpy as jnp
from jax.experimental import pallas as pl
from jax.experimental.pallas import tpu as pltpu
import numpy as np


def _activation(name, x):
    """Mirror of get_activation() for the activations we support."""
    if name in ("siren", "sin"):
        return jnp.sin(x)
    if name == "relu":
        return jnp.maximum(x, 0.0)
    if name == "tanh":
        return jnp.tanh(x)
    if name == "sigmoid":
        return jax.nn.sigmoid(x)
    raise ValueError(f"unsupported activation: {name}")


def pointgencon_kernel(x_ref, w1_ref, b1_ref, w2_ref, b2_ref,
                       w3_ref, b3_ref, w4_ref, b4_ref, out_ref,
                       *, activation):
    # x_ref  : (1, C0, tn)      f32   native-layout point tile (points on lanes)
    # wN_ref : (Cn, C_{n-1})    bf16  BN-folded conv weight (1..3) / conv4 weight
    # bN_ref : (Cn, 1)          f32   BN-folded bias (1..3) / conv4 bias
    # out_ref: (1, C4, tn)      f32
    x = x_ref[0].astype(jnp.bfloat16)                       # (C0, tn)

    # layer 1: conv1 (+ folded bn1) + relu
    h = jnp.dot(w1_ref[...], x, preferred_element_type=jnp.float32) + b1_ref[...]
    h = jnp.maximum(h, 0.0)

    # layer 2: conv2 (+ folded bn2) + relu
    h = jnp.dot(w2_ref[...], h.astype(jnp.bfloat16),
                preferred_element_type=jnp.float32) + b2_ref[...]
    h = jnp.maximum(h, 0.0)

    # layer 3: conv3 (+ folded bn3) + relu
    h = jnp.dot(w3_ref[...], h.astype(jnp.bfloat16),
                preferred_element_type=jnp.float32) + b3_ref[...]
    h = jnp.maximum(h, 0.0)

    # layer 4: conv4 + siren (sin)
    y = jnp.dot(w4_ref[...], h.astype(jnp.bfloat16),
                preferred_element_type=jnp.float32) + b4_ref[...]
    out_ref[0] = _activation(activation, y).astype(out_ref.dtype)


def _round_up(a, b):
    return ((a + b - 1) // b) * b


def _align_channels(c):
    # Internal channel dims: 128-multiples for large layers (clean MXU tiles),
    # 8-multiples (sublane) for small ones.
    return _round_up(c, 128) if c >= 128 else _round_up(c, 8)


def _vmem_limit_bytes():
    # Derive per-generation: ~96 MiB on v5e/v6e (128 MiB VMEM), ~48 MiB on v7x
    # (64 MiB per TensorCore) — leave headroom for compiler scratch.
    try:
        cap = int(pltpu.get_tpu_info().vmem_capacity_bytes)
    except Exception:
        cap = 64 * 1024 * 1024          # conservative fallback (v7x per-TC)
    return (cap * 3) // 4


def pointgencon_pallas(x, params, *, activation="siren", eps=1e-5,
                       point_tile=512):
    """x: (B, C0, N) float32 (PyTorch Conv1d layout). Returns (B, out_dim, N) f32."""
    (w1, cb1, g1, be1, m1, v1,
     w2, cb2, g2, be2, m2, v2,
     w3, cb3, g3, be3, m3, v3,
     w4, cb4) = params

    B, C0, N = x.shape
    C1, C2, C3, C4 = w1.shape[0], w2.shape[0], w3.shape[0], w4.shape[0]

    # Zero-pad only the *internal* channel dims (touches weights/biases only,
    # so x never needs an extra HBM pass).  Padded output rows have zero weight
    # and bias -> relu(0) = 0, and the next layer's padded input columns have
    # zero weights -> numerics unchanged.
    C1p, C2p, C3p = _align_channels(C1), _align_channels(C2), _align_channels(C3)

    def fold(w, cb, g, be, m, v, cout_p, cin_p):
        # eval-mode BN folded into the 1x1 conv: y = s*(W x + cb) + (be - s*m)
        s = g / jnp.sqrt(v + eps)                         # (Cout,)
        w_eff = w * s[:, None]                            # (Cout, Cin)
        b_eff = s * cb + be - m * s                       # (Cout,)
        w_eff = jnp.pad(w_eff, ((0, cout_p - w_eff.shape[0]),
                                (0, cin_p - w_eff.shape[1])))
        b_eff = jnp.pad(b_eff, (0, cout_p - b_eff.shape[0]))
        return (w_eff.astype(jnp.bfloat16),
                b_eff.reshape(-1, 1).astype(jnp.float32))

    w1e, b1e = fold(w1, cb1, g1, be1, m1, v1, C1p, C0)
    w2e, b2e = fold(w2, cb2, g2, be2, m2, v2, C2p, C1p)
    w3e, b3e = fold(w3, cb3, g3, be3, m3, v3, C3p, C2p)
    w4e = jnp.pad(w4, ((0, 0), (0, C3p - C3))).astype(jnp.bfloat16)   # (C4, C3p)
    b4e = cb4.reshape(-1, 1).astype(jnp.float32)                      # (C4, 1)

    # Point tiling: points sit on lanes, so tile_n is a multiple of 128 or the
    # full extent N.  Partial edge blocks are fine: the op is pointwise along
    # N, so unspecified padded lanes never contaminate valid outputs and their
    # writeback is masked by Pallas.
    point_tile = max(128, _round_up(point_tile, 128))
    tn = point_tile if N > point_tile else N
    grid = (B, pl.cdiv(N, tn))      # >= 2 programs whenever B >= 2 (v7x megacore)

    def make_call(single_buffer_weights):
        const_kwargs = {}
        if single_buffer_weights and hasattr(pl, "Buffered"):
            # Constant-index weights never re-DMA; single-buffering halves their
            # VMEM footprint (needed to fit ~20 MB bf16 weights on v7x).
            const_kwargs = dict(pipeline_mode=pl.Buffered(1))

        def const_spec(arr):
            nd = arr.ndim
            return pl.BlockSpec(arr.shape, lambda b, j: (0,) * nd, **const_kwargs)

        flops = 2 * B * N * (C0 * C1p + C1p * C2p + C2p * C3p + C3p * C4)
        bytes_accessed = (B * C0 * N * 4 + B * C4 * N * 4
                          + 2 * (C1p * C0 + C2p * C1p + C3p * C2p + C4 * C3p)
                          + 4 * (C1p + C2p + C3p + C4))
        cost = pl.CostEstimate(flops=int(flops),
                               transcendentals=int(B * N * C4),
                               bytes_accessed=int(bytes_accessed))

        return pl.pallas_call(
            functools.partial(pointgencon_kernel, activation=activation),
            out_shape=jax.ShapeDtypeStruct((B, C4, N), jnp.float32),
            grid=grid,
            in_specs=[
                pl.BlockSpec((1, C0, tn), lambda b, j: (b, 0, j)),   # streamed x
                const_spec(w1e), const_spec(b1e),                    # resident
                const_spec(w2e), const_spec(b2e),
                const_spec(w3e), const_spec(b3e),
                const_spec(w4e), const_spec(b4e),
            ],
            out_specs=pl.BlockSpec((1, C4, tn), lambda b, j: (b, 0, j)),
            compiler_params=pltpu.CompilerParams(
                dimension_semantics=("parallel", "parallel"),
                vmem_limit_bytes=_vmem_limit_bytes()),
            cost_estimate=cost,
        )

    args = (x, w1e, b1e, w2e, b2e, w3e, b3e, w4e, b4e)
    try:
        return make_call(True)(*args)
    except Exception:
        # Fallback for jax versions without pl.Buffered(1): default double
        # buffering (identical numerics, larger VMEM footprint).
        return make_call(False)(*args)


def pointgencon_reference(x, params, *, activation="siren", eps=1e-5):
    """Pure-JAX reference matching the PyTorch forward (eval-mode BN)."""
    (w1, cb1, g1, be1, m1, v1,
     w2, cb2, g2, be2, m2, v2,
     w3, cb3, g3, be3, m3, v3,
     w4, cb4) = params

    def conv1x1(h, w, b):
        return jnp.einsum('oc,bcn->bon', w, h) + b[None, :, None]

    def bn(h, g, be, m, v):
        s = g / jnp.sqrt(v + eps)
        return (h - m[None, :, None]) * s[None, :, None] + be[None, :, None]

    h = jnp.maximum(bn(conv1x1(x, w1, cb1), g1, be1, m1, v1), 0.0)
    h = jnp.maximum(bn(conv1x1(h, w2, cb2), g2, be2, m2, v2), 0.0)
    h = jnp.maximum(bn(conv1x1(h, w3, cb3), g3, be3, m3, v3), 0.0)
    y = conv1x1(h, w4, cb4)
    return _activation(activation, y)


if __name__ == "__main__":
    # Small stand-in for the defaults (bottleneck_size=2500, output_dim=3):
    # batch=2, bottleneck=32, points=16, output_dim=3.
    B, bottleneck, n_points, out_dim = 2, 32, 16, 3
    C0 = C1 = bottleneck
    C2 = bottleneck // 2
    C3 = bottleneck // 4
    eps = 1e-5

    key = jax.random.PRNGKey(0)
    ks = jax.random.split(key, 24)

    def winit(k, co, ci):
        return jax.random.normal(k, (co, ci), jnp.float32) / jnp.sqrt(ci)

    def binit(k, c):
        return 0.05 * jax.random.normal(k, (c,), jnp.float32)

    def bn_params(k, c):
        k1, k2, k3, k4 = jax.random.split(k, 4)
        gamma = 1.0 + 0.1 * jax.random.normal(k1, (c,), jnp.float32)
        beta = 0.1 * jax.random.normal(k2, (c,), jnp.float32)
        mean = 0.05 * jax.random.normal(k3, (c,), jnp.float32)
        var = 1.0 + 0.2 * jnp.abs(jax.random.normal(k4, (c,), jnp.float32))
        return gamma, beta, mean, var

    x = jax.random.normal(ks[0], (B, C0, n_points), jnp.float32)

    w1 = winit(ks[1], C1, C0); cb1 = binit(ks[2], C1)
    g1, be1, m1, v1 = bn_params(ks[3], C1)
    w2 = winit(ks[4], C2, C1); cb2 = binit(ks[5], C2)
    g2, be2, m2, v2 = bn_params(ks[6], C2)
    w3 = winit(ks[7], C3, C2); cb3 = binit(ks[8], C3)
    g3, be3, m3, v3 = bn_params(ks[9], C3)
    w4 = winit(ks[10], out_dim, C3); cb4 = binit(ks[11], out_dim)

    params = (w1, cb1, g1, be1, m1, v1,
              w2, cb2, g2, be2, m2, v2,
              w3, cb3, g3, be3, m3, v3,
              w4, cb4)

    out = jax.block_until_ready(pointgencon_pallas(x, params, activation="siren"))
    ref = jax.block_until_ready(pointgencon_reference(x, params, activation="siren"))

    # Tolerance accounts for bf16 MXU operands (f32 accumulation).
    np.testing.assert_allclose(np.asarray(out), np.asarray(ref),
                               rtol=5e-2, atol=5e-2)

    print("KERNEL_OK")
</pallas_src>

<mosaic_0001>
module attributes {stable_mosaic.version = 11 : i64} {
  func.func @pointgencon_kernel(%arg0: i32, %arg1: i32, %arg2: memref<1x32x16xf32, #tpu.memory_space<vmem>>, %arg3: memref<32x32xbf16, #tpu.memory_space<vmem>>, %arg4: memref<32x1xf32, #tpu.memory_space<vmem>>, %arg5: memref<16x32xbf16, #tpu.memory_space<vmem>>, %arg6: memref<16x1xf32, #tpu.memory_space<vmem>>, %arg7: memref<8x16xbf16, #tpu.memory_space<vmem>>, %arg8: memref<8x1xf32, #tpu.memory_space<vmem>>, %arg9: memref<3x8xbf16, #tpu.memory_space<vmem>>, %arg10: memref<3x1xf32, #tpu.memory_space<vmem>>, %arg11: memref<1x3x16xf32, #tpu.memory_space<vmem>>) attributes {dimension_semantics = [#tpu.dimension_semantics<parallel>, #tpu.dimension_semantics<parallel>], iteration_bounds = array<i64: 2, 1>, scalar_prefetch = 0 : i64, scratch_operands = 0 : i64, tpu.core_type = #tpu.core_type<tc>, window_params = [{transform_indices = @transform_0, window_bounds = array<i64: 1, 32, 16>}, {pipeline_mode = #tpu.pipeline_mode<synchronous>, transform_indices = @transform_1, window_bounds = array<i64: 32, 32>}, {pipeline_mode = #tpu.pipeline_mode<synchronous>, transform_indices = @transform_2, window_bounds = array<i64: 32, 1>}, {pipeline_mode = #tpu.pipeline_mode<synchronous>, transform_indices = @transform_3, window_bounds = array<i64: 16, 32>}, {pipeline_mode = #tpu.pipeline_mode<synchronous>, transform_indices = @transform_4, window_bounds = array<i64: 16, 1>}, {pipeline_mode = #tpu.pipeline_mode<synchronous>, transform_indices = @transform_5, window_bounds = array<i64: 8, 16>}, {pipeline_mode = #tpu.pipeline_mode<synchronous>, transform_indices = @transform_6, window_bounds = array<i64: 8, 1>}, {pipeline_mode = #tpu.pipeline_mode<synchronous>, transform_indices = @transform_7, window_bounds = array<i64: 3, 8>}, {pipeline_mode = #tpu.pipeline_mode<synchronous>, transform_indices = @transform_8, window_bounds = array<i64: 3, 1>}, {transform_indices = @transform_9, window_bounds = array<i64: 1, 3, 16>}]} {
    %c0 = arith.constant 0 : index
    %c0_0 = arith.constant 0 : index
    %c0_1 = arith.constant 0 : index
    %0 = vector.load %arg2[%c0, %c0_0, %c0_1] : memref<1x32x16xf32, #tpu.memory_space<vmem>>, vector<1x32x16xf32>
    %1 = vector.shape_cast %0 : vector<1x32x16xf32> to vector<32x16xf32>
    %2 = arith.truncf %1 : vector<32x16xf32> to vector<32x16xbf16>
    %c0_2 = arith.constant 0 : index
    %c0_3 = arith.constant 0 : index
    %3 = vector.load %arg3[%c0_2, %c0_3] : memref<32x32xbf16, #tpu.memory_space<vmem>>, vector<32x32xbf16>
    %cst = arith.constant dense<0.000000e+00> : vector<32x16xf32>
    %4 = tpu.matmul %3, %2, %cst {dimension_numbers = #tpu.dot_dimension_numbers<[1], [0], [0], [1], [0, 0, 1, 1], [], []>} : vector<32x32xbf16>, vector<32x16xbf16>, vector<32x16xf32> -> vector<32x16xf32>
    %c0_4 = arith.constant 0 : index
    %c0_5 = arith.constant 0 : index
    %5 = vector.load %arg4[%c0_4, %c0_5] : memref<32x1xf32, #tpu.memory_space<vmem>>, vector<32x1xf32>
    %6 = vector.broadcast %5 : vector<32x1xf32> to vector<32x16xf32>
    %7 = arith.addf %4, %6 : vector<32x16xf32>
    %cst_6 = arith.constant 0.000000e+00 : f32
    %8 = vector.broadcast %cst_6 : f32 to vector<32x16xf32>
    %9 = arith.maximumf %7, %8 : vector<32x16xf32>
    %c0_7 = arith.constant 0 : index
    %c0_8 = arith.constant 0 : index
    %10 = vector.load %arg5[%c0_7, %c0_8] : memref<16x32xbf16, #tpu.memory_space<vmem>>, vector<16x32xbf16>
    %11 = arith.truncf %9 : vector<32x16xf32> to vector<32x16xbf16>
    %cst_9 = arith.constant dense<0.000000e+00> : vector<16x16xf32>
    %12 = tpu.matmul %10, %11, %cst_9 {dimension_numbers = #tpu.dot_dimension_numbers<[1], [0], [0], [1], [0, 0, 1, 1], [], []>} : vector<16x32xbf16>, vector<32x16xbf16>, vector<16x16xf32> -> vector<16x16xf32>
    %c0_10 = arith.constant 0 : index
    %c0_11 = arith.constant 0 : index
    %13 = vector.load %arg6[%c0_10, %c0_11] : memref<16x1xf32, #tpu.memory_space<vmem>>, vector<16x1xf32>
    %14 = vector.broadcast %13 : vector<16x1xf32> to vector<16x16xf32>
    %15 = arith.addf %12, %14 : vector<16x16xf32>
    %cst_12 = arith.constant 0.000000e+00 : f32
    %16 = vector.broadcast %cst_12 : f32 to vector<16x16xf32>
    %17 = arith.maximumf %15, %16 : vector<16x16xf32>
    %c0_13 = arith.constant 0 : index
    %c0_14 = arith.constant 0 : index
    %18 = vector.load %arg7[%c0_13, %c0_14] : memref<8x16xbf16, #tpu.memory_space<vmem>>, vector<8x16xbf16>
    %19 = arith.truncf %17 : vector<16x16xf32> to vector<16x16xbf16>
    %cst_15 = arith.constant dense<0.000000e+00> : vector<8x16xf32>
    %20 = tpu.matmul %18, %19, %cst_15 {dimension_numbers = #tpu.dot_dimension_numbers<[1], [0], [0], [1], [0, 0, 1, 1], [], []>} : vector<8x16xbf16>, vector<16x16xbf16>, vector<8x16xf32> -> vector<8x16xf32>
    %c0_16 = arith.constant 0 : index
    %c0_17 = arith.constant 0 : index
    %21 = vector.load %arg8[%c0_16, %c0_17] : memref<8x1xf32, #tpu.memory_space<vmem>>, vector<8x1xf32>
    %22 = vector.broadcast %21 : vector<8x1xf32> to vector<8x16xf32>
    %23 = arith.addf %20, %22 : vector<8x16xf32>
    %cst_18 = arith.constant 0.000000e+00 : f32
    %24 = vector.broadcast %cst_18 : f32 to vector<8x16xf32>
    %25 = arith.maximumf %23, %24 : vector<8x16xf32>
    %c0_19 = arith.constant 0 : index
    %c0_20 = arith.constant 0 : index
    %26 = vector.load %arg9[%c0_19, %c0_20] : memref<3x8xbf16, #tpu.memory_space<vmem>>, vector<3x8xbf16>
    %27 = arith.truncf %25 : vector<8x16xf32> to vector<8x16xbf16>
    %cst_21 = arith.constant dense<0.000000e+00> : vector<3x16xf32>
    %28 = tpu.matmul %26, %27, %cst_21 {dimension_numbers = #tpu.dot_dimension_numbers<[1], [0], [0], [1], [0, 0, 1, 1], [], []>} : vector<3x8xbf16>, vector<8x16xbf16>, vector<3x16xf32> -> vector<3x16xf32>
    %c0_22 = arith.constant 0 : index
    %c0_23 = arith.constant 0 : index
    %29 = vector.load %arg10[%c0_22, %c0_23] : memref<3x1xf32, #tpu.memory_space<vmem>>, vector<3x1xf32>
    %30 = vector.broadcast %29 : vector<3x1xf32> to vector<3x16xf32>
    %31 = arith.addf %28, %30 : vector<3x16xf32>
    %32 = math.sin %31 : vector<3x16xf32>
    %c0_24 = arith.constant 0 : index
    %c0_25 = arith.constant 0 : index
    %c0_26 = arith.constant 0 : index
    %33 = vector.load %arg11[%c0_24, %c0_25, %c0_26] : memref<1x3x16xf32, #tpu.memory_space<vmem>>, vector<1x3x16xf32>
    %34 = vector.shape_cast %33 : vector<1x3x16xf32> to vector<3x16xf32>
    %35 = vector.shape_cast %32 : vector<3x16xf32> to vector<1x3x16xf32>
    tpu.vector_store %arg11[%c0_24, %c0_25, %c0_26], %35 {strides = array<i32>} : memref<1x3x16xf32, #tpu.memory_space<vmem>>, vector<1x3x16xf32>,
    return
  }
  func.func @transform_0(%arg0: i32, %arg1: i32) -> (i32, i32, i32) {
    %c0_i32 = arith.constant 0 : i32
    %c0_i32_0 = arith.constant 0 : i32
    return %arg0, %c0_i32, %arg1 : i32, i32, i32
  }
  func.func @transform_1(%arg0: i32, %arg1: i32) -> (i32, i32) {
    %c0_i32 = arith.constant 0 : i32
    %c0_i32_0 = arith.constant 0 : i32
    %c0_i32_1 = arith.constant 0 : i32
    return %c0_i32, %c0_i32_0 : i32, i32
  }
  func.func @transform_2(%arg0: i32, %arg1: i32) -> (i32, i32) {
    %c0_i32 = arith.constant 0 : i32
    %c0_i32_0 = arith.constant 0 : i32
    %c0_i32_1 = arith.constant 0 : i32
    return %c0_i32, %c0_i32_0 : i32, i32
  }
  func.func @transform_3(%arg0: i32, %arg1: i32) -> (i32, i32) {
    %c0_i32 = arith.constant 0 : i32
    %c0_i32_0 = arith.constant 0 : i32
    %c0_i32_1 = arith.constant 0 : i32
    return %c0_i32, %c0_i32_0 : i32, i32
  }
  func.func @transform_4(%arg0: i32, %arg1: i32) -> (i32, i32) {
    %c0_i32 = arith.constant 0 : i32
    %c0_i32_0 = arith.constant 0 : i32
    %c0_i32_1 = arith.constant 0 : i32
    return %c0_i32, %c0_i32_0 : i32, i32
  }
  func.func @transform_5(%arg0: i32, %arg1: i32) -> (i32, i32) {
    %c0_i32 = arith.constant 0 : i32
    %c0_i32_0 = arith.constant 0 : i32
    %c0_i32_1 = arith.constant 0 : i32
    return %c0_i32, %c0_i32_0 : i32, i32
  }
  func.func @transform_6(%arg0: i32, %arg1: i32) -> (i32, i32) {
    %c0_i32 = arith.constant 0 : i32
    %c0_i32_0 = arith.constant 0 : i32
    %c0_i32_1 = arith.constant 0 : i32
    return %c0_i32, %c0_i32_0 : i32, i32
  }
  func.func @transform_7(%arg0: i32, %arg1: i32) -> (i32, i32) {
    %c0_i32 = arith.constant 0 : i32
    %c0_i32_0 = arith.constant 0 : i32
    %c0_i32_1 = arith.constant 0 : i32
    return %c0_i32, %c0_i32_0 : i32, i32
  }
  func.func @transform_8(%arg0: i32, %arg1: i32) -> (i32, i32) {
    %c0_i32 = arith.constant 0 : i32
    %c0_i32_0 = arith.constant 0 : i32
    %c0_i32_1 = arith.constant 0 : i32
    return %c0_i32, %c0_i32_0 : i32, i32
  }
  func.func @transform_9(%arg0: i32, %arg1: i32) -> (i32, i32, i32) {
    %c0_i32 = arith.constant 0 : i32
    %c0_i32_0 = arith.constant 0 : i32
    return %arg0, %c0_i32, %arg1 : i32, i32, i32
  }
}

module attributes {stable_mosaic.version = 11 : i64} {
  func.func @pointgencon_kernel(%arg0: i32, %arg1: i32, %arg2: memref<1x32x16xf32, #tpu.memory_space<vmem>>, %arg3: memref<32x32xbf16, #tpu.memory_space<vmem>>, %arg4: memref<32x1xf32, #tpu.memory_space<vmem>>, %arg5: memref<16x32xbf16, #tpu.memory_space<vmem>>, %arg6: memref<16x1xf32, #tpu.memory_space<vmem>>, %arg7: memref<8x16xbf16, #tpu.memory_space<vmem>>, %arg8: memref<8x1xf32, #tpu.memory_space<vmem>>, %arg9: memref<3x8xbf16, #tpu.memory_space<vmem>>, %arg10: memref<3x1xf32, #tpu.memory_space<vmem>>, %arg11: memref<1x3x16xf32, #tpu.memory_space<vmem>>) attributes {dimension_semantics = [#tpu.dimension_semantics<parallel>, #tpu.dimension_semantics<parallel>], iteration_bounds = array<i64: 2, 1>, scalar_prefetch = 0 : i64, scratch_operands = 0 : i64, tpu.core_type = #tpu.core_type<tc>, window_params = [{transform_indices = @transform_0, window_bounds = array<i64: 1, 32, 16>}, {pipeline_mode = #tpu.pipeline_mode<synchronous>, transform_indices = @transform_1, window_bounds = array<i64: 32, 32>}, {pipeline_mode = #tpu.pipeline_mode<synchronous>, transform_indices = @transform_2, window_bounds = array<i64: 32, 1>}, {pipeline_mode = #tpu.pipeline_mode<synchronous>, transform_indices = @transform_3, window_bounds = array<i64: 16, 32>}, {pipeline_mode = #tpu.pipeline_mode<synchronous>, transform_indices = @transform_4, window_bounds = array<i64: 16, 1>}, {pipeline_mode = #tpu.pipeline_mode<synchronous>, transform_indices = @transform_5, window_bounds = array<i64: 8, 16>}, {pipeline_mode = #tpu.pipeline_mode<synchronous>, transform_indices = @transform_6, window_bounds = array<i64: 8, 1>}, {pipeline_mode = #tpu.pipeline_mode<synchronous>, transform_indices = @transform_7, window_bounds = array<i64: 3, 8>}, {pipeline_mode = #tpu.pipeline_mode<synchronous>, transform_indices = @transform_8, window_bounds = array<i64: 3, 1>}, {transform_indices = @transform_9, window_bounds = array<i64: 1, 3, 16>}]} {
    %c0 = arith.constant 0 : index
    %c0_0 = arith.constant 0 : index
    %c0_1 = arith.constant 0 : index
    %0 = vector.load %arg2[%c0, %c0_0, %c0_1] : memref<1x32x16xf32, #tpu.memory_space<vmem>>, vector<1x32x16xf32>
    %1 = vector.shape_cast %0 : vector<1x32x16xf32> to vector<32x16xf32>
    %2 = arith.truncf %1 : vector<32x16xf32> to vector<32x16xbf16>
    %c0_2 = arith.constant 0 : index
    %c0_3 = arith.constant 0 : index
    %3 = vector.load %arg3[%c0_2, %c0_3] : memref<32x32xbf16, #tpu.memory_space<vmem>>, vector<32x32xbf16>
    %cst = arith.constant dense<0.000000e+00> : vector<32x16xf32>
    %4 = tpu.matmul %3, %2, %cst {dimension_numbers = #tpu.dot_dimension_numbers<[1], [0], [0], [1], [0, 0, 1, 1], [], []>} : vector<32x32xbf16>, vector<32x16xbf16>, vector<32x16xf32> -> vector<32x16xf32>
    %c0_4 = arith.constant 0 : index
    %c0_5 = arith.constant 0 : index
    %5 = vector.load %arg4[%c0_4, %c0_5] : memref<32x1xf32, #tpu.memory_space<vmem>>, vector<32x1xf32>
    %6 = vector.broadcast %5 : vector<32x1xf32> to vector<32x16xf32>
    %7 = arith.addf %4, %6 : vector<32x16xf32>
    %cst_6 = arith.constant 0.000000e+00 : f32
    %8 = vector.broadcast %cst_6 : f32 to vector<32x16xf32>
    %9 = arith.maximumf %7, %8 : vector<32x16xf32>
    %c0_7 = arith.constant 0 : index
    %c0_8 = arith.constant 0 : index
    %10 = vector.load %arg5[%c0_7, %c0_8] : memref<16x32xbf16, #tpu.memory_space<vmem>>, vector<16x32xbf16>
    %11 = arith.truncf %9 : vector<32x16xf32> to vector<32x16xbf16>
    %cst_9 = arith.constant dense<0.000000e+00> : vector<16x16xf32>
    %12 = tpu.matmul %10, %11, %cst_9 {dimension_numbers = #tpu.dot_dimension_numbers<[1], [0], [0], [1], [0, 0, 1, 1], [], []>} : vector<16x32xbf16>, vector<32x16xbf16>, vector<16x16xf32> -> vector<16x16xf32>
    %c0_10 = arith.constant 0 : index
    %c0_11 = arith.constant 0 : index
    %13 = vector.load %arg6[%c0_10, %c0_11] : memref<16x1xf32, #tpu.memory_space<vmem>>, vector<16x1xf32>
    %14 = vector.broadcast %13 : vector<16x1xf32> to vector<16x16xf32>
    %15 = arith.addf %12, %14 : vector<16x16xf32>
    %cst_12 = arith.constant 0.000000e+00 : f32
    %16 = vector.broadcast %cst_12 : f32 to vector<16x16xf32>
    %17 = arith.maximumf %15, %16 : vector<16x16xf32>
    %c0_13 = arith.constant 0 : index
    %c0_14 = arith.constant 0 : index
    %18 = vector.load %arg7[%c0_13, %c0_14] : memref<8x16xbf16, #tpu.memory_space<vmem>>, vector<8x16xbf16>
    %19 = arith.truncf %17 : vector<16x16xf32> to vector<16x16xbf16>
    %cst_15 = arith.constant dense<0.000000e+00> : vector<8x16xf32>
    %20 = tpu.matmul %18, %19, %cst_15 {dimension_numbers = #tpu.dot_dimension_numbers<[1], [0], [0], [1], [0, 0, 1, 1], [], []>} : vector<8x16xbf16>, vector<16x16xbf16>, vector<8x16xf32> -> vector<8x16xf32>
    %c0_16 = arith.constant 0 : index
    %c0_17 = arith.constant 0 : index
    %21 = vector.load %arg8[%c0_16, %c0_17] : memref<8x1xf32, #tpu.memory_space<vmem>>, vector<8x1xf32>
    %22 = vector.broadcast %21 : vector<8x1xf32> to vector<8x16xf32>
    %23 = arith.addf %20, %22 : vector<8x16xf32>
    %cst_18 = arith.constant 0.000000e+00 : f32
    %24 = vector.broadcast %cst_18 : f32 to vector<8x16xf32>
    %25 = arith.maximumf %23, %24 : vector<8x16xf32>
    %c0_19 = arith.constant 0 : index
    %c0_20 = arith.constant 0 : index
    %26 = vector.load %arg9[%c0_19, %c0_20] : memref<3x8xbf16, #tpu.memory_space<vmem>>, vector<3x8xbf16>
    %27 = arith.truncf %25 : vector<8x16xf32> to vector<8x16xbf16>
    %cst_21 = arith.constant dense<0.000000e+00> : vector<3x16xf32>
    %28 = tpu.matmul %26, %27, %cst_21 {dimension_numbers = #tpu.dot_dimension_numbers<[1], [0], [0], [1], [0, 0, 1, 1], [], []>} : vector<3x8xbf16>, vector<8x16xbf16>, vector<3x16xf32> -> vector<3x16xf32>
    %c0_22 = arith.constant 0 : index
    %c0_23 = arith.constant 0 : index
    %29 = vector.load %arg10[%c0_22, %c0_23] : memref<3x1xf32, #tpu.memory_space<vmem>>, vector<3x1xf32>
    %30 = vector.broadcast %29 : vector<3x1xf32> to vector<3x16xf32>
    %31 = arith.addf %28, %30 : vector<3x16xf32>
    %32 = math.sin %31 : vector<3x16xf32>
    %c0_24 = arith.constant 0 : index
    %c0_25 = arith.constant 0 : index
    %c0_26 = arith.constant 0 : index
    %33 = vector.load %arg11[%c0_24, %c0_25, %c0_26] : memref<1x3x16xf32, #tpu.memory_space<vmem>>, vector<1x3x16xf32>
    %34 = vector.shape_cast %33 : vector<1x3x16xf32> to vector<3x16xf32>
    %35 = vector.shape_cast %32 : vector<3x16xf32> to vector<1x3x16xf32>
    tpu.vector_store %arg11[%c0_24, %c0_25, %c0_26], %35 {strides = array<i32>} : memref<1x3x16xf32, #tpu.memory_space<vmem>>, vector<1x3x16xf32>,
    return
  }
  func.func @transform_0(%arg0: i32, %arg1: i32) -> (i32, i32, i32) {
    %c0_i32 = arith.constant 0 : i32
    %c0_i32_0 = arith.constant 0 : i32
    return %arg0, %c0_i32, %arg1 : i32, i32, i32
  }
  func.func @transform_1(%arg0: i32, %arg1: i32) -> (i32, i32) {
    %c0_i32 = arith.constant 0 : i32
    %c0_i32_0 = arith.constant 0 : i32
    %c0_i32_1 = arith.constant 0 : i32
    return %c0_i32, %c0_i32_0 : i32, i32
  }
  func.func @transform_2(%arg0: i32, %arg1: i32) -> (i32, i32) {
    %c0_i32 = arith.constant 0 : i32
    %c0_i32_0 = arith.constant 0 : i32
    %c0_i32_1 = arith.constant 0 : i32
    return %c0_i32, %c0_i32_0 : i32, i32
  }
  func.func @transform_3(%arg0: i32, %arg1: i32) -> (i32, i32) {
    %c0_i32 = arith.constant 0 : i32
    %c0_i32_0 = arith.constant 0 : i32
    %c0_i32_1 = arith.constant 0 : i32
    return %c0_i32, %c0_i32_0 : i32, i32
  }
  func.func @transform_4(%arg0: i32, %arg1: i32) -> (i32, i32) {
    %c0_i32 = arith.constant 0 : i32
    %c0_i32_0 = arith.constant 0 : i32
    %c0_i32_1 = arith.constant 0 : i32
    return %c0_i32, %c0_i32_0 : i32, i32
  }
  func.func @transform_5(%arg0: i32, %arg1: i32) -> (i32, i32) {
    %c0_i32 = arith.constant 0 : i32
    %c0_i32_0 = arith.constant 0 : i32
    %c0_i32_1 = arith.constant 0 : i32
    return %c0_i32, %c0_i32_0 : i32, i32
  }
  func.func @transform_6(%arg0: i32, %arg1: i32) -> (i32, i32) {
    %c0_i32 = arith.constant 0 : i32
    %c0_i32_0 = arith.constant 0 : i32
    %c0_i32_1 = arith.constant 0 : i32
    return %c0_i32, %c0_i32_0 : i32, i32
  }
  func.func @transform_7(%arg0: i32, %arg1: i32) -> (i32, i32) {
    %c0_i32 = arith.constant 0 : i32
    %c0_i32_0 = arith.constant 0 : i32
    %c0_i32_1 = arith.constant 0 : i32
    return %c0_i32, %c0_i32_0 : i32, i32
  }
  func.func @transform_8(%arg0: i32, %arg1: i32) -> (i32, i32) {
    %c0_i32 = arith.constant 0 : i32
    %c0_i32_0 = arith.constant 0 : i32
    %c0_i32_1 = arith.constant 0 : i32
    return %c0_i32, %c0_i32_0 : i32, i32
  }
  func.func @transform_9(%arg0: i32, %arg1: i32) -> (i32, i32, i32) {
    %c0_i32 = arith.constant 0 : i32
    %c0_i32_0 = arith.constant 0 : i32
    return %arg0, %c0_i32, %arg1 : i32, i32, i32
  }
}

</mosaic_0001>

<bundles_post_ra>
// kernel: tpu_custom_call.1
= control target key start
LH: loop header
LB: loop body
LE: loop exit
PB: predicated region body
PF: predicated region fallthrough
CT: control target
= control target key end

     0   :  { %s1017_s30 = smov 0   ;;  %s1019_s10 = smov 0   ;;  %s1120_s0 = inlined_call_operand.vmem [shape: f32[2,32,16], index: 0, kind: input, shape index: {}]   ;;  %s1121_s1 = inlined_call_operand.vmem [shape: bf16[32,32], index: 1, kind: input, shape index: {}]   ;;  %s1122_s2 = inlined_call_operand.vmem [shape: f32[32,1], index: 2, kind: input, shape index: {}]   ;;  %s1123_s3 = inlined_call_operand.vmem [shape: bf16[16,32], index: 3, kind: input, shape index: {}]   ;;  %s1124_s4 = inlined_call_operand.vmem [shape: f32[16,1], index: 4, kind: input, shape index: {}]   ;;  %s1125_s5 = inlined_call_operand.vmem [shape: bf16[8,16], index: 5, kind: input, shape index: {}]   ;;  %s1126_s6 = inlined_call_operand.vmem [shape: f32[8,1], index: 6, kind: input, shape index: {}]   ;;  %s1127_s7 = inlined_call_operand.vmem [shape: bf16[3,8], index: 7, kind: input, shape index: {}]   ;;  %s1128_s8 = inlined_call_operand.vmem [shape: f32[3,1], index: 8, kind: input, shape index: {}]   ;;  %s1129_s9 = inlined_call_operand.vmem [shape: f32[2,3,16], index: 9, kind: output, shape index: {}]  }
   0x1   :  { %s1021_s11 = smov 0  }
   0x2 LB: > { %s31_s12 = sadd.s32 1, %s952_s10  ;;  %p830_p0 = scmp.ge.s32.totalorder %s956_s11, 1  ;;  %s956_s11 = sphi %s1021_s11, %s19_s11   ;;  %s952_s10 = sphi %s1019_s10, %s1131_s10   ;;  %s948_s30 = sphi %s1017_s30, %s1130_s30  }
   0x3   : > { %p33_p1 = scmp.ge.s32.totalorder %s31_s12, 2  ;;  %p306_p2 = scmp.lt.s32.totalorder %s956_s11, 3 }
   0x5   : > { %s1133_s12 = smov (%p33_p1, %s31_s12), 0  ;;  %p307_p3 = pnand %p830_p0, %p306_p2 }
   0x6   : > { %p347_p4 = scmp.lt.s32.totalorder (!%p307_p3), %s948_s30, 1  ;;  %v927_v0 = vld [vmem:[%s1121_s1] sm:$0xff] (!%p307_p3)   ;;  %vm407_vm0 = vcmask (!%p307_p3), 261120   ;;  %v375_v2 = vld [vmem:[%s1122_s2 + $0x10] sm:$0xff] (!%p307_p3)  ;;  %v958_v3 = vmov (!%p307_p3), 0   ;;  %v374_v4 = vld [vmem:[%s1122_s2 + $0x8] sm:$0xff] (!%p307_p3) }
   0x7   : > { %310 = sbr.rel (%p307_p3) target bundleno = 995 (0x3e3), region = 56  ;;  %864 = vmatprep.mubr.msk.bf16.mxu0 (!%p307_p3), %vm407_vm0, %v927_v0  ;;  %v373_v1 = vld [vmem:[%s1122_s2] sm:$0xff] (!%p307_p3)  ;;  %925 = vset.pattern.permute.xlu0 (!%p307_p3), %v958_v3  ;;  %v376_v5 = vld [vmem:[%s1122_s2 + $0x18] sm:$0xff] (!%p307_p3)  ;;  %v472_v13 = vld [vmem:[%s1124_s4 + $0x8] sm:$0xff] (!%p307_p3)  ;;  %v959_v17 = vmov (!%p307_p3), 0.0   ;;  %vm960_vm1 = vmmov (!%p307_p3), 0  }
   0x8   : > { %926 = vset.pattern.permute.xlu1 (!%p307_p3), %v958_v3  ;;  %379 = vperm.xlu0 (!%p307_p3), %925, %v373_v1   ;;  %v471_v12 = vld [vmem:[%s1124_s4] sm:$0xff] (!%p307_p3)  ;;  %v928_v14 = vld [vmem:[%s1121_s1 + $0x8] sm:$0xff] (!%p307_p3)   ;;  %vm542_vm2 = vcmask (!%p307_p3), 130048   ;;  %vm599_vm3 = vcmask (!%p307_p3), 1043456   ;;  %vm595_vm4 = vcmask (!%p307_p3), 64512  }
   0x9   : > { %389 = vperm.xlu1 (!%p307_p3), %926, %v375_v2   ;;  %v536_v15 = vld [vmem:[%s1126_s6] sm:$0xff] (!%p307_p3)  ;;  %868 = vmatprep.subr.bf16.mxu1 (!%p307_p3), %v959_v17 }
   0xa   : > { %v589_v16 = vld [vmem:[%s1128_s8] sm:$0x7] (!%p307_p3)  ;;  %872 = vmatprep.mubr.msk.bf16.mxu1 (!%p307_p3), %vm960_vm1, %v959_v17 }
   0xb   : > { %v929_v36 = vld [vmem:[%s1123_s3] sm:$0xff] (!%p307_p3)  }
   0xc   : > { %384 = vperm.xlu0 (!%p307_p3), %925, %v374_v4   ;;  %v534_v48 = vld [vmem:[%s1125_s5] sm:$0xf] (!%p307_p3) }
   0xd   : > { %394 = vperm.xlu1 (!%p307_p3), %926, %v376_v5   ;;  %v587_v58 = vld [vmem:[%s1127_s7] sm:$0x3] (!%p307_p3) }
   0xe   : > { %s1135_s30 = smov (!%p347_p4, %s948_s30), 1 }
   0xf   : > { %s848_s19 = sshll.u32 %s1135_s30, 5  ;;  %s833_s26 = sshll.u32 %s1135_s30, 2 }
  0x10   : > { %s354_s24 = scalar_lea.vmem %s1120_s0, %s848_s19  ;;  %475 = vperm.xlu0 %925, %v471_v12   ;;  %s361_s29 = scalar_lea.vmem %s1129_s9, %s833_s26 }
  0x11   : > { %v363_v6 = vld [vmem:[%s354_s24] sm:$0xff]  ;;  %v364_v7 = vld [vmem:[%s354_s24 + $0x8] sm:$0xff]  ;;  %v365_v8 = vld [vmem:[%s354_s24 + $0x10] sm:$0xff]  ;;  %480 = vperm.xlu1 %926, %v472_v13   ;;  %v962_v13 = vmov 2475754826  }
  0x12   : > { %v367_v9 = vpack.c.bf16 %v364_v7, %v363_v6  ;;  %v366_v10 = vld [vmem:[%s354_s24 + $0x18] sm:$0xff] }
  0x13   : > { %v368_v11 = vpack.c.bf16 %v366_v10, %v365_v8 }
  0x14   : > { %860 = vmatprep.subr.bf16.mxu0 %v367_v9  ;;  %539 = vperm.xlu0 %925, %v536_v15  }
  0x15   : > { %861 = vmatpush3.bf16.msra.mxu0 %v367_v9  ;;  %592 = vperm.xlu1 %926, %v589_v16   ;;  %v963_v16 = vmov 2131351028  }
  0x16   : > { %862 = vmatprep.subr.bf16.mxu0 %v368_v11 }
  0x19   : > { %863 = vmatpush3.bf16.msra.mxu0 %v368_v11  ;;  %v961_v11 = vmov 683565275  }
  0x1a   : > { %876 = vmatprep.subr.bf16.mxu0 %v959_v17 }
  0x1c   : > { %865 = vmatmul.mubr.msk.bf16.vlgmr.msra.gmra.mrb[0].mxu0 %vm407_vm0, %v928_v14 }
  0x1d   : > { %878 = vmatprep.mubr.msk.bf16.mxu0 %vm960_vm1, %v959_v17 }
  0x87   : > { %v380_v19 = vpop.permute.xlu0 %379 }
  0x88   : > { %v390_v18 = vpop.permute.xlu1 %389 }
  0x8b   : > { %v385_v26 = vpop.permute.xlu0 %384 }
  0x8c   : > { %v395_v23 = vpop.permute.xlu1 %394 }
  0x8f   : > { %v476_v37 = vpop.permute.xlu0 %475 }
  0x90   : > { %v481_v41 = vpop.permute.xlu1 %480 }
  0x93   : > { %v540_v49 = vpop.permute.xlu0 %539 }
  0x94   : > { %v593_v59 = vpop.permute.xlu1 %592 }
  0xef   : > { %v866_v20 = vpop.f32.mrb[0].mxu0 }
  0xf0   : > { %v457_v21 = vadd.f32 %v866_v20, %v390_v18  ;;  %v448_v22 = vpop.f32.mrb[1].mxu0 }
  0xf1   : > { %v449_v24 = vadd.f32 %v448_v22, %v380_v19  ;;  %v867_v25 = vpop.f32.mrb[2].mxu0  ;;  %v964_v19 = vmov 2102212464   ;;  %v965_v22 = vmov 920167782  }
  0xf2   : > { %v460_v27 = vadd.f32 %v867_v25, %v395_v23  ;;  %v451_v28 = vpop.f32.mrb[3].mxu0  ;;  %v465_v30 = vmax.f32 %v457_v21, 0.0  ;;  %v966_v25 = vmov 1326507024  }
  0xf3   : > { %v452_v29 = vadd.f32 %v451_v28, %v385_v26  ;;  %v463_v32 = vmax.f32 %v449_v24, 0.0 }
  0xf4   : > { %v466_v31 = vmax.f32 %v460_v27, 0.0 }
  0xf5   : > { %v464_v33 = vmax.f32 %v452_v29, 0.0 }
  0xf6   : > { %v470_v34 = vpack.c.bf16 %v466_v31, %v465_v30 }
  0xf7   : > { %v469_v35 = vpack.c.bf16 %v464_v33, %v463_v32 }
  0xf9   : > { %869 = vmatpush3.bf16.msra.mxu1 %v469_v35 }
  0xfa   : > { %870 = vmatprep.subr.bf16.mxu1 %v959_v17 }
  0xfd   : > { %871 = vmatpush3.bf16.msra.mxu1 %v470_v34 }
  0xfe   : > { %882 = vmatprep.subr.bf16.mxu1 %v959_v17 }
 0x100   : > { %873 = vmatmul.mubr.msk.bf16.vlgmr.msra.gmra.mrb[0].mxu1 %vm407_vm0, %v929_v36 }
 0x101   : > { %884 = vmatprep.mubr.msk.bf16.mxu1 %vm960_vm1, %v959_v17  ;;  %vm747_vm1 = vcmask 124928  }
 0x1d3   : > { %v525_v38 = vpop.f32.mrb[0].mxu1 }
 0x1d4   : > { %v526_v39 = vadd.f32 %v525_v38, %v476_v37  ;;  %v874_v40 = vpop.f32.mrb[1].mxu1 }
 0x1d5   : > { %v528_v42 = vpop.f32.mrb[2].mxu1 }
 0x1d6   : > { %v529_v43 = vadd.f32 %v528_v42, %v481_v41  ;;  %v875_v44 = vpop.f32.mrb[3].mxu1  ;;  %v532_v45 = vmax.f32 %v526_v39, 0.0 }
 0x1d8   : > { %v533_v46 = vmax.f32 %v529_v43, 0.0 }
 0x1da   : > { %v535_v47 = vpack.c.bf16 %v533_v46, %v532_v45 }
 0x1dc   : > { %877 = vmatpush3.bf16.msra.mxu0 %v535_v47 }
 0x1df   : > { %879 = vmatmul.mubr.msk.bf16.vlgmr.msra.gmra.mrb[4].mxu0 %vm542_vm2, %v534_v48 }
 0x2b2   : > { %v580_v50 = vpop.f32.mrb[4].mxu0 }
 0x2b3   : > { %v581_v51 = vadd.f32 %v580_v50, %v540_v49  ;;  %v880_v52 = vpop.f32.mrb[5].mxu0 }
 0x2b4   : > { %v583_v53 = vpop.f32.mrb[6].mxu0 }
 0x2b5   : > { %v586_v54 = vmax.f32 %v581_v51, 0.0  ;;  %v881_v55 = vpop.f32.mrb[7].mxu0 }
 0x2b7   : > { %v588_v56 = vpack.c.bf16 %v586_v54, %v586_v54 }
 0x2b9   : > { %v601_v57 = vsel %vm599_vm3, %v588_v56, 0 }
 0x2ba   : > { %883 = vmatpush3.bf16.msra.mxu1 %v601_v57 }
 0x2bd   : > { %885 = vmatmul.mubr.msk.bf16.vlgmr.msra.gmra.mrb[4].mxu1 %vm595_vm4, %v587_v58 }
 0x390   : > { %v637_v60 = vpop.f32.mrb[4].mxu1 }
 0x391   : > { %v1086_v61 = vadd.f32 %v637_v60, %v593_v59  ;;  %v886_v62 = vpop.f32.mrb[5].mxu1 }
 0x392   : > { %v640_v63 = vpop.f32.mrb[6].mxu1 }
 0x393   : > { %v646_v0 = vand.u32 2139095040, %v1086_v61  ;;  %v887_v1 = vpop.f32.mrb[7].mxu1  ;;  %v643_v5 = vand.u32 2147483647, %v1086_v61  ;;  %vm645_vm12 = vcmp.lt.s32.totalorder %v1086_v61, 0  ;;  %vm735_vm2 = vweird.f32 %v1086_v61 }
 0x395   : > { %v647_v2 = vshrl.u32 %v646_v0, 23  ;;  %v650_v8 = vand.u32 8388607, %v643_v5  ;;  %vm644_vm13 = vcmp.le.f32.partialorder %v643_v5, 0.7853982 }
 0x397   : > { %v842_v3 = vadd.s32 4294967169, %v647_v2  ;;  %v651_v27 = vor.u32 8388608, %v650_v8 }
 0x399   : > { %v653_v4 = vadd.s32 1, %v842_v3  ;;  %v691_v41 = vshll.u32 %v651_v27, 8 }
 0x39b   : > { %vm654_vm5 = vcmp.gt.s32.totalorder %v653_v4, 0 }
 0x39c   : > { %v655_v6 = vsel %vm654_vm5, %v653_v4, 0 }
 0x39d   : > { %v657_v7 = vand.u32 31, %v655_v6  ;;  %v656_v10 = vshrl.u32 %v655_v6, 5 }
 0x39f   : > { %v658_v9 = vsub.s32 32, %v657_v7  ;;  %v660_v12 = vshll.u32 %v961_v11, %v657_v7  ;;  %v663_v14 = vshll.u32 %v962_v13, %v657_v7  ;;  %v666_v18 = vshll.u32 %v963_v16, %v657_v7 }
 0x3a0   : > { %v669_v21 = vshll.u32 %v964_v19, %v657_v7  ;;  %v672_v24 = vshll.u32 %v965_v22, %v657_v7  ;;  %vm675_vm6 = vcmp.lt.s32.totalorder %v656_v10, 1  ;;  %vm678_vm7 = vcmp.lt.s32.totalorder %v656_v10, 4 }
 0x3a1   : > { %v661_v15 = vshrl.u32 %v962_v13, %v658_v9  ;;  %v664_v17 = vshrl.u32 %v963_v16, %v658_v9  ;;  %v667_v20 = vshrl.u32 %v964_v19, %v658_v9  ;;  %v670_v23 = vshrl.u32 %v965_v22, %v658_v9 }
 0x3a2   : > { %v673_v26 = vshrl.u32 %v966_v25, %v658_v9  ;;  %v659_v36 = vshrl.u32 %v961_v11, %v658_v9  ;;  %vm677_vm8 = vcmp.lt.s32.totalorder %v656_v10, 3  ;;  %vm676_vm9 = vcmp.lt.s32.totalorder %v656_v10, 2 }
 0x3a3   : > { %v662_v28 = vor.u32 %v661_v15, %v660_v12  ;;  %v665_v29 = vor.u32 %v664_v17, %v663_v14  ;;  %v668_v30 = vor.u32 %v667_v20, %v666_v18  ;;  %v671_v31 = vor.u32 %v670_v23, %v669_v21 }
 0x3a4   : > { %v674_v32 = vor.u32 %v673_v26, %v672_v24 }
 0x3a5   : > { %v680_v33 = vsel %vm678_vm7, %v668_v30, 2102212464  ;;  %v683_v34 = vsel %vm675_vm6, %v662_v28, %v665_v29  ;;  %v687_v35 = vsel %vm675_vm6, %v665_v29, %v668_v30  ;;  %v684_v37 = vsel %vm678_vm7, %v671_v31, 920167782 }
 0x3a6   : > { %v688_v38 = vsel %vm678_vm7, %v674_v32, 1326507024  ;;  %v685_v39 = vsel %vm677_vm8, %v668_v30, %v684_v37  ;;  %v679_v42 = vsel %vm675_vm6, %v659_v36, %v662_v28  ;;  %v681_v43 = vsel %vm677_vm8, %v665_v29, %v680_v33 }
 0x3a7   : > { %v689_v40 = vsel %vm677_vm8, %v671_v31, %v688_v38  ;;  %v686_v44 = vsel %vm676_vm9, %v683_v34, %v685_v39  ;;  %v682_v50 = vsel %vm676_vm9, %v679_v42, %v681_v43 }
 0x3a8   : > { %v690_v45 = vsel %vm676_vm9, %v687_v35, %v689_v40  ;;  %v1095_v48 = vmul.u32.u64.low %v691_v41, %v686_v44  ;;  %v1096_v49 = vmul.u32.u64.high %v691_v41, %v686_v44, %v1095_v48  ;;  %v698_v52 = vmul.u32 %v691_v41, %v682_v50 }
 0x3a9   : > { %v1092_v46 = vmul.u32.u64.low %v691_v41, %v690_v45  ;;  %v1093_v47 = vmul.u32.u64.high %v691_v41, %v690_v45, %v1092_v46 }
 0x3aa   : > { %v701_v51 = vadd.s32 1, %v1096_v49 }
 0x3ab   : > { %vm700_vm10 = vc.u32 %v1093_v47, %v1095_v48  ;;  %v699_v1 = vadd.s32 %v1095_v48, %v1093_v47 }
 0x3ac   : > { %v702_v53 = vsel %vm700_vm10, %v701_v51, %v1096_v49 }
 0x3ad   : > { %v703_v54 = vadd.s32 %v702_v53, %v698_v52 }
 0x3af   : > { %v704_v55 = vadd.s32 536870912, %v703_v54 }
 0x3b1   : > { %v705_v56 = vshrl.u32 %v704_v55, 30 }
 0x3b3   : > { %v706_v57 = vshll.u32 %v705_v56, 30  ;;  %v729_v14 = vsub.s32 4, %v705_v56 }
 0x3b5   : > { %v707_v58 = vsub.s32 %v703_v54, %v706_v57  ;;  %v730_v17 = vsel %vm645_vm12, %v729_v14, %v705_v56 }
 0x3b6   : > { %v732_v19 = vsel %vm644_vm13, 0, %v730_v17 }
 0x3b7   : > { %v709_v59 = vsub.s32 0, %v707_v58  ;;  %v736_v20 = vadd.s32 3, %v732_v19 }
 0x3b9   : > { %v843_v60 = vmin.u32 %v709_v59, %v707_v58  ;;  %v737_v21 = vand.u32 3, %v736_v20 }
 0x3bb   : > { %v711_v62 = vclz %v843_v60  ;;  %vm742_vm14 = vcmp.eq.s32.totalorder %v737_v21, 2  ;;  %vm739_vm15 = vcmp.eq.s32.totalorder %v737_v21, 0  ;;  %vm738_vm0 = vcmp.lt.s32.totalorder %v737_v21, 2 }
 0x3bd   : > { %v844_v63 = vadd.s32 4294967294, %v711_v62 }
 0x3bf   : > { %vm845_vm11 = vcmp.lt.s32.totalorder %v844_v63, 0 }
 0x3c0   : > { %v714_v0 = vsel %vm845_vm11, 0, %v844_v63 }
 0x3c1   : > { %v715_v2 = vsub.s32 32, %v714_v0  ;;  %v719_v3 = vsub.s32 4294967266, %v714_v0  ;;  %v716_v4 = vshll.u32 %v707_v58, %v714_v0 }
 0x3c3   : > { %v717_v6 = vshrl.u32 %v699_v1, %v715_v2  ;;  %v720_v7 = vadd.s32 127, %v719_v3 }
 0x3c5   : > { %v718_v8 = vor.u32 %v717_v6, %v716_v4  ;;  %v721_v9 = vshll.u32 %v720_v7, 23 }
 0x3c7   : > { %v722_v10 = vor.u32 4788187, %v721_v9  ;;  %v725_v12 = vcvt.s32.f32 %v718_v8 }
 0x3c9   : > { %v723_v11 = vand.u32 2147483647, %v722_v10 }
 0x3cb   : > { %v726_v13 = vmul.f32 %v725_v12, %v723_v11 }
 0x3cd   : > { %v727_v15 = vxor.u32 2147483648, %v726_v13 }
 0x3cf   : > { %v728_v16 = vsel %vm645_vm12, %v727_v15, %v726_v13 }
 0x3d0   : > { %v731_v18 = vsel %vm644_vm13, %v1086_v61, %v728_v16 }
 0x3d1   : > { %930 = vcosq.f32 %v731_v18 }
 0x3d2   : > { %932 = vsinq.f32 %v731_v18 }
 0x3db   : > { %v931_v22 = vpop.eup %930 }
 0x3dc   : > { %v933_v23 = vpop.eup %932  ;;  %v743_v24 = vxor.u32 2147483648, %v931_v22 }
 0x3dd   : > { %v740_v25 = vxor.u32 2147483648, %v933_v23 }
 0x3de   : > { %v744_v26 = vsel %vm742_vm14, %v743_v24, %v933_v23 }
 0x3df   : > { %v741_v5 = vsel %vm739_vm15, %v931_v22, %v740_v25 }
 0x3e0   : > { %v745_v27 = vsel %vm738_vm0, %v741_v5, %v744_v26 }
 0x3e1   : > { %v746_v28 = vsel %vm735_vm2, nan, %v745_v27 }
 0x3e2   : > { %748 = vst.msk [vmem:[%s361_s29] sm:$0x7] %vm747_vm1, %v746_v28 }
 0x3e3 PF: > { %s19_s11 = sadd.s32 1, %s956_s11   ;;  %s1130_s30 = smov %s952_s10 }
 0x3e4   : > { %p16_p5 = scmp.ge.s32.totalorder %s19_s11, 4   ;;  %s1131_s10 = smov %s1133_s12 }
 0x3e6   :  { %18 = sbr.rel (!%p16_p5) target bundleno = 2 (0x2), region = 86 }

// kernel: tpu_custom_call.1
= control target key start
LH: loop header
LB: loop body
LE: loop exit
PB: predicated region body
PF: predicated region fallthrough
CT: control target
= control target key end

     0   :  { %s1017_s30 = smov 0   ;;  %s1019_s10 = smov 0   ;;  %s1120_s0 = inlined_call_operand.vmem [shape: f32[2,32,16], index: 0, kind: input, shape index: {}]   ;;  %s1121_s1 = inlined_call_operand.vmem [shape: bf16[32,32], index: 1, kind: input, shape index: {}]   ;;  %s1122_s2 = inlined_call_operand.vmem [shape: f32[32,1], index: 2, kind: input, shape index: {}]   ;;  %s1123_s3 = inlined_call_operand.vmem [shape: bf16[16,32], index: 3, kind: input, shape index: {}]   ;;  %s1124_s4 = inlined_call_operand.vmem [shape: f32[16,1], index: 4, kind: input, shape index: {}]   ;;  %s1125_s5 = inlined_call_operand.vmem [shape: bf16[8,16], index: 5, kind: input, shape index: {}]   ;;  %s1126_s6 = inlined_call_operand.vmem [shape: f32[8,1], index: 6, kind: input, shape index: {}]   ;;  %s1127_s7 = inlined_call_operand.vmem [shape: bf16[3,8], index: 7, kind: input, shape index: {}]   ;;  %s1128_s8 = inlined_call_operand.vmem [shape: f32[3,1], index: 8, kind: input, shape index: {}]   ;;  %s1129_s9 = inlined_call_operand.vmem [shape: f32[2,3,16], index: 9, kind: output, shape index: {}]  }
   0x1   :  { %s1021_s11 = smov 0  }
   0x2 LB: > { %s31_s12 = sadd.s32 1, %s952_s10  ;;  %p830_p0 = scmp.ge.s32.totalorder %s956_s11, 1  ;;  %s956_s11 = sphi %s1021_s11, %s19_s11   ;;  %s952_s10 = sphi %s1019_s10, %s1131_s10   ;;  %s948_s30 = sphi %s1017_s30, %s1130_s30  }
   0x3   : > { %p33_p1 = scmp.ge.s32.totalorder %s31_s12, 2  ;;  %p306_p2 = scmp.lt.s32.totalorder %s956_s11, 3 }
   0x5   : > { %s1133_s12 = smov (%p33_p1, %s31_s12), 0  ;;  %p307_p3 = pnand %p830_p0, %p306_p2 }
   0x6   : > { %p347_p4 = scmp.lt.s32.totalorder (!%p307_p3), %s948_s30, 1  ;;  %v927_v0 = vld [vmem:[%s1121_s1] sm:$0xff] (!%p307_p3)   ;;  %vm407_vm0 = vcmask (!%p307_p3), 261120   ;;  %v375_v2 = vld [vmem:[%s1122_s2 + $0x10] sm:$0xff] (!%p307_p3)  ;;  %v958_v3 = vmov (!%p307_p3), 0   ;;  %v374_v4 = vld [vmem:[%s1122_s2 + $0x8] sm:$0xff] (!%p307_p3) }
   0x7   : > { %310 = sbr.rel (%p307_p3) target bundleno = 995 (0x3e3), region = 56  ;;  %864 = vmatprep.mubr.msk.bf16.mxu0 (!%p307_p3), %vm407_vm0, %v927_v0  ;;  %v373_v1 = vld [vmem:[%s1122_s2] sm:$0xff] (!%p307_p3)  ;;  %925 = vset.pattern.permute.xlu0 (!%p307_p3), %v958_v3  ;;  %v376_v5 = vld [vmem:[%s1122_s2 + $0x18] sm:$0xff] (!%p307_p3)  ;;  %v472_v13 = vld [vmem:[%s1124_s4 + $0x8] sm:$0xff] (!%p307_p3)  ;;  %v959_v17 = vmov (!%p307_p3), 0.0   ;;  %vm960_vm1 = vmmov (!%p307_p3), 0  }
   0x8   : > { %926 = vset.pattern.permute.xlu1 (!%p307_p3), %v958_v3  ;;  %379 = vperm.xlu0 (!%p307_p3), %925, %v373_v1   ;;  %v471_v12 = vld [vmem:[%s1124_s4] sm:$0xff] (!%p307_p3)  ;;  %v928_v14 = vld [vmem:[%s1121_s1 + $0x8] sm:$0xff] (!%p307_p3)   ;;  %vm542_vm2 = vcmask (!%p307_p3), 130048   ;;  %vm599_vm3 = vcmask (!%p307_p3), 1043456   ;;  %vm595_vm4 = vcmask (!%p307_p3), 64512  }
   0x9   : > { %389 = vperm.xlu1 (!%p307_p3), %926, %v375_v2   ;;  %v536_v15 = vld [vmem:[%s1126_s6] sm:$0xff] (!%p307_p3)  ;;  %868 = vmatprep.subr.bf16.mxu1 (!%p307_p3), %v959_v17 }
   0xa   : > { %v589_v16 = vld [vmem:[%s1128_s8] sm:$0x7] (!%p307_p3)  ;;  %872 = vmatprep.mubr.msk.bf16.mxu1 (!%p307_p3), %vm960_vm1, %v959_v17 }
   0xb   : > { %v929_v36 = vld [vmem:[%s1123_s3] sm:$0xff] (!%p307_p3)  }
   0xc   : > { %384 = vperm.xlu0 (!%p307_p3), %925, %v374_v4   ;;  %v534_v48 = vld [vmem:[%s1125_s5] sm:$0xf] (!%p307_p3) }
   0xd   : > { %394 = vperm.xlu1 (!%p307_p3), %926, %v376_v5   ;;  %v587_v58 = vld [vmem:[%s1127_s7] sm:$0x3] (!%p307_p3) }
   0xe   : > { %s1135_s30 = smov (!%p347_p4, %s948_s30), 1 }
   0xf   : > { %s848_s19 = sshll.u32 %s1135_s30, 5  ;;  %s833_s26 = sshll.u32 %s1135_s30, 2 }
  0x10   : > { %s354_s24 = scalar_lea.vmem %s1120_s0, %s848_s19  ;;  %475 = vperm.xlu0 %925, %v471_v12   ;;  %s361_s29 = scalar_lea.vmem %s1129_s9, %s833_s26 }
  0x11   : > { %v363_v6 = vld [vmem:[%s354_s24] sm:$0xff]  ;;  %v364_v7 = vld [vmem:[%s354_s24 + $0x8] sm:$0xff]  ;;  %v365_v8 = vld [vmem:[%s354_s24 + $0x10] sm:$0xff]  ;;  %480 = vperm.xlu1 %926, %v472_v13   ;;  %v962_v13 = vmov 2475754826  }
  0x12   : > { %v367_v9 = vpack.c.bf16 %v364_v7, %v363_v6  ;;  %v366_v10 = vld [vmem:[%s354_s24 + $0x18] sm:$0xff] }
  0x13   : > { %v368_v11 = vpack.c.bf16 %v366_v10, %v365_v8 }
  0x14   : > { %860 = vmatprep.subr.bf16.mxu0 %v367_v9  ;;  %539 = vperm.xlu0 %925, %v536_v15  }
  0x15   : > { %861 = vmatpush3.bf16.msra.mxu0 %v367_v9  ;;  %592 = vperm.xlu1 %926, %v589_v16   ;;  %v963_v16 = vmov 2131351028  }
  0x16   : > { %862 = vmatprep.subr.bf16.mxu0 %v368_v11 }
  0x19   : > { %863 = vmatpush3.bf16.msra.mxu0 %v368_v11  ;;  %v961_v11 = vmov 683565275  }
  0x1a   : > { %876 = vmatprep.subr.bf16.mxu0 %v959_v17 }
  0x1c   : > { %865 = vmatmul.mubr.msk.bf16.vlgmr.msra.gmra.mrb[0].mxu0 %vm407_vm0, %v928_v14 }
  0x1d   : > { %878 = vmatprep.mubr.msk.bf16.mxu0 %vm960_vm1, %v959_v17 }
  0x87   : > { %v380_v19 = vpop.permute.xlu0 %379 }
  0x88   : > { %v390_v18 = vpop.permute.xlu1 %389 }
  0x8b   : > { %v385_v26 = vpop.permute.xlu0 %384 }
  0x8c   : > { %v395_v23 = vpop.permute.xlu1 %394 }
  0x8f   : > { %v476_v37 = vpop.permute.xlu0 %475 }
  0x90   : > { %v481_v41 = vpop.permute.xlu1 %480 }
  0x93   : > { %v540_v49 = vpop.permute.xlu0 %539 }
  0x94   : > { %v593_v59 = vpop.permute.xlu1 %592 }
  0xef   : > { %v866_v20 = vpop.f32.mrb[0].mxu0 }
  0xf0   : > { %v457_v21 = vadd.f32 %v866_v20, %v390_v18  ;;  %v448_v22 = vpop.f32.mrb[1].mxu0 }
  0xf1   : > { %v449_v24 = vadd.f32 %v448_v22, %v380_v19  ;;  %v867_v25 = vpop.f32.mrb[2].mxu0  ;;  %v964_v19 = vmov 2102212464   ;;  %v965_v22 = vmov 920167782  }
  0xf2   : > { %v460_v27 = vadd.f32 %v867_v25, %v395_v23  ;;  %v451_v28 = vpop.f32.mrb[3].mxu0  ;;  %v465_v30 = vmax.f32 %v457_v21, 0.0  ;;  %v966_v25 = vmov 1326507024  }
  0xf3   : > { %v452_v29 = vadd.f32 %v451_v28, %v385_v26  ;;  %v463_v32 = vmax.f32 %v449_v24, 0.0 }
  0xf4   : > { %v466_v31 = vmax.f32 %v460_v27, 0.0 }
  0xf5   : > { %v464_v33 = vmax.f32 %v452_v29, 0.0 }
  0xf6   : > { %v470_v34 = vpack.c.bf16 %v466_v31, %v465_v30 }
  0xf7   : > { %v469_v35 = vpack.c.bf16 %v464_v33, %v463_v32 }
  0xf9   : > { %869 = vmatpush3.bf16.msra.mxu1 %v469_v35 }
  0xfa   : > { %870 = vmatprep.subr.bf16.mxu1 %v959_v17 }
  0xfd   : > { %871 = vmatpush3.bf16.msra.mxu1 %v470_v34 }
  0xfe   : > { %882 = vmatprep.subr.bf16.mxu1 %v959_v17 }
 0x100   : > { %873 = vmatmul.mubr.msk.bf16.vlgmr.msra.gmra.mrb[0].mxu1 %vm407_vm0, %v929_v36 }
 0x101   : > { %884 = vmatprep.mubr.msk.bf16.mxu1 %vm960_vm1, %v959_v17  ;;  %vm747_vm1 = vcmask 124928  }
 0x1d3   : > { %v525_v38 = vpop.f32.mrb[0].mxu1 }
 0x1d4   : > { %v526_v39 = vadd.f32 %v525_v38, %v476_v37  ;;  %v874_v40 = vpop.f32.mrb[1].mxu1 }
 0x1d5   : > { %v528_v42 = vpop.f32.mrb[2].mxu1 }
 0x1d6   : > { %v529_v43 = vadd.f32 %v528_v42, %v481_v41  ;;  %v875_v44 = vpop.f32.mrb[3].mxu1  ;;  %v532_v45 = vmax.f32 %v526_v39, 0.0 }
 0x1d8   : > { %v533_v46 = vmax.f32 %v529_v43, 0.0 }
 0x1da   : > { %v535_v47 = vpack.c.bf16 %v533_v46, %v532_v45 }
 0x1dc   : > { %877 = vmatpush3.bf16.msra.mxu0 %v535_v47 }
 0x1df   : > { %879 = vmatmul.mubr.msk.bf16.vlgmr.msra.gmra.mrb[4].mxu0 %vm542_vm2, %v534_v48 }
 0x2b2   : > { %v580_v50 = vpop.f32.mrb[4].mxu0 }
 0x2b3   : > { %v581_v51 = vadd.f32 %v580_v50, %v540_v49  ;;  %v880_v52 = vpop.f32.mrb[5].mxu0 }
 0x2b4   : > { %v583_v53 = vpop.f32.mrb[6].mxu0 }
 0x2b5   : > { %v586_v54 = vmax.f32 %v581_v51, 0.0  ;;  %v881_v55 = vpop.f32.mrb[7].mxu0 }
 0x2b7   : > { %v588_v56 = vpack.c.bf16 %v586_v54, %v586_v54 }
 0x2b9   : > { %v601_v57 = vsel %vm599_vm3, %v588_v56, 0 }
 0x2ba   : > { %883 = vmatpush3.bf16.msra.mxu1 %v601_v57 }
 0x2bd   : > { %885 = vmatmul.mubr.msk.bf16.vlgmr.msra.gmra.mrb[4].mxu1 %vm595_vm4, %v587_v58 }
 0x390   : > { %v637_v60 = vpop.f32.mrb[4].mxu1 }
 0x391   : > { %v1086_v61 = vadd.f32 %v637_v60, %v593_v59  ;;  %v886_v62 = vpop.f32.mrb[5].mxu1 }
 0x392   : > { %v640_v63 = vpop.f32.mrb[6].mxu1 }
 0x393   : > { %v646_v0 = vand.u32 2139095040, %v1086_v61  ;;  %v887_v1 = vpop.f32.mrb[7].mxu1  ;;  %v643_v5 = vand.u32 2147483647, %v1086_v61  ;;  %vm645_vm12 = vcmp.lt.s32.totalorder %v1086_v61, 0  ;;  %vm735_vm2 = vweird.f32 %v1086_v61 }
 0x395   : > { %v647_v2 = vshrl.u32 %v646_v0, 23  ;;  %v650_v8 = vand.u32 8388607, %v643_v5  ;;  %vm644_vm13 = vcmp.le.f32.partialorder %v643_v5, 0.7853982 }
 0x397   : > { %v842_v3 = vadd.s32 4294967169, %v647_v2  ;;  %v651_v27 = vor.u32 8388608, %v650_v8 }
 0x399   : > { %v653_v4 = vadd.s32 1, %v842_v3  ;;  %v691_v41 = vshll.u32 %v651_v27, 8 }
 0x39b   : > { %vm654_vm5 = vcmp.gt.s32.totalorder %v653_v4, 0 }
 0x39c   : > { %v655_v6 = vsel %vm654_vm5, %v653_v4, 0 }
 0x39d   : > { %v657_v7 = vand.u32 31, %v655_v6  ;;  %v656_v10 = vshrl.u32 %v655_v6, 5 }
 0x39f   : > { %v658_v9 = vsub.s32 32, %v657_v7  ;;  %v660_v12 = vshll.u32 %v961_v11, %v657_v7  ;;  %v663_v14 = vshll.u32 %v962_v13, %v657_v7  ;;  %v666_v18 = vshll.u32 %v963_v16, %v657_v7 }
 0x3a0   : > { %v669_v21 = vshll.u32 %v964_v19, %v657_v7  ;;  %v672_v24 = vshll.u32 %v965_v22, %v657_v7  ;;  %vm675_vm6 = vcmp.lt.s32.totalorder %v656_v10, 1  ;;  %vm678_vm7 = vcmp.lt.s32.totalorder %v656_v10, 4 }
 0x3a1   : > { %v661_v15 = vshrl.u32 %v962_v13, %v658_v9  ;;  %v664_v17 = vshrl.u32 %v963_v16, %v658_v9  ;;  %v667_v20 = vshrl.u32 %v964_v19, %v658_v9  ;;  %v670_v23 = vshrl.u32 %v965_v22, %v658_v9 }
 0x3a2   : > { %v673_v26 = vshrl.u32 %v966_v25, %v658_v9  ;;  %v659_v36 = vshrl.u32 %v961_v11, %v658_v9  ;;  %vm677_vm8 = vcmp.lt.s32.totalorder %v656_v10, 3  ;;  %vm676_vm9 = vcmp.lt.s32.totalorder %v656_v10, 2 }
 0x3a3   : > { %v662_v28 = vor.u32 %v661_v15, %v660_v12  ;;  %v665_v29 = vor.u32 %v664_v17, %v663_v14  ;;  %v668_v30 = vor.u32 %v667_v20, %v666_v18  ;;  %v671_v31 = vor.u32 %v670_v23, %v669_v21 }
 0x3a4   : > { %v674_v32 = vor.u32 %v673_v26, %v672_v24 }
 0x3a5   : > { %v680_v33 = vsel %vm678_vm7, %v668_v30, 2102212464  ;;  %v683_v34 = vsel %vm675_vm6, %v662_v28, %v665_v29  ;;  %v687_v35 = vsel %vm675_vm6, %v665_v29, %v668_v30  ;;  %v684_v37 = vsel %vm678_vm7, %v671_v31, 920167782 }
 0x3a6   : > { %v688_v38 = vsel %vm678_vm7, %v674_v32, 1326507024  ;;  %v685_v39 = vsel %vm677_vm8, %v668_v30, %v684_v37  ;;  %v679_v42 = vsel %vm675_vm6, %v659_v36, %v662_v28  ;;  %v681_v43 = vsel %vm677_vm8, %v665_v29, %v680_v33 }
 0x3a7   : > { %v689_v40 = vsel %vm677_vm8, %v671_v31, %v688_v38  ;;  %v686_v44 = vsel %vm676_vm9, %v683_v34, %v685_v39  ;;  %v682_v50 = vsel %vm676_vm9, %v679_v42, %v681_v43 }
 0x3a8   : > { %v690_v45 = vsel %vm676_vm9, %v687_v35, %v689_v40  ;;  %v1095_v48 = vmul.u32.u64.low %v691_v41, %v686_v44  ;;  %v1096_v49 = vmul.u32.u64.high %v691_v41, %v686_v44, %v1095_v48  ;;  %v698_v52 = vmul.u32 %v691_v41, %v682_v50 }
 0x3a9   : > { %v1092_v46 = vmul.u32.u64.low %v691_v41, %v690_v45  ;;  %v1093_v47 = vmul.u32.u64.high %v691_v41, %v690_v45, %v1092_v46 }
 0x3aa   : > { %v701_v51 = vadd.s32 1, %v1096_v49 }
 0x3ab   : > { %vm700_vm10 = vc.u32 %v1093_v47, %v1095_v48  ;;  %v699_v1 = vadd.s32 %v1095_v48, %v1093_v47 }
 0x3ac   : > { %v702_v53 = vsel %vm700_vm10, %v701_v51, %v1096_v49 }
 0x3ad   : > { %v703_v54 = vadd.s32 %v702_v53, %v698_v52 }
 0x3af   : > { %v704_v55 = vadd.s32 536870912, %v703_v54 }
 0x3b1   : > { %v705_v56 = vshrl.u32 %v704_v55, 30 }
 0x3b3   : > { %v706_v57 = vshll.u32 %v705_v56, 30  ;;  %v729_v14 = vsub.s32 4, %v705_v56 }
 0x3b5   : > { %v707_v58 = vsub.s32 %v703_v54, %v706_v57  ;;  %v730_v17 = vsel %vm645_vm12, %v729_v14, %v705_v56 }
 0x3b6   : > { %v732_v19 = vsel %vm644_vm13, 0, %v730_v17 }
 0x3b7   : > { %v709_v59 = vsub.s32 0, %v707_v58  ;;  %v736_v20 = vadd.s32 3, %v732_v19 }
 0x3b9   : > { %v843_v60 = vmin.u32 %v709_v59, %v707_v58  ;;  %v737_v21 = vand.u32 3, %v736_v20 }
 0x3bb   : > { %v711_v62 = vclz %v843_v60  ;;  %vm742_vm14 = vcmp.eq.s32.totalorder %v737_v21, 2  ;;  %vm739_vm15 = vcmp.eq.s32.totalorder %v737_v21, 0  ;;  %vm738_vm0 = vcmp.lt.s32.totalorder %v737_v21, 2 }
 0x3bd   : > { %v844_v63 = vadd.s32 4294967294, %v711_v62 }
 0x3bf   : > { %vm845_vm11 = vcmp.lt.s32.totalorder %v844_v63, 0 }
 0x3c0   : > { %v714_v0 = vsel %vm845_vm11, 0, %v844_v63 }
 0x3c1   : > { %v715_v2 = vsub.s32 32, %v714_v0  ;;  %v719_v3 = vsub.s32 4294967266, %v714_v0  ;;  %v716_v4 = vshll.u32 %v707_v58, %v714_v0 }
 0x3c3   : > { %v717_v6 = vshrl.u32 %v699_v1, %v715_v2  ;;  %v720_v7 = vadd.s32 127, %v719_v3 }
 0x3c5   : > { %v718_v8 = vor.u32 %v717_v6, %v716_v4  ;;  %v721_v9 = vshll.u32 %v720_v7, 23 }
 0x3c7   : > { %v722_v10 = vor.u32 4788187, %v721_v9  ;;  %v725_v12 = vcvt.s32.f32 %v718_v8 }
 0x3c9   : > { %v723_v11 = vand.u32 2147483647, %v722_v10 }
 0x3cb   : > { %v726_v13 = vmul.f32 %v725_v12, %v723_v11 }
 0x3cd   : > { %v727_v15 = vxor.u32 2147483648, %v726_v13 }
 0x3cf   : > { %v728_v16 = vsel %vm645_vm12, %v727_v15, %v726_v13 }
 0x3d0   : > { %v731_v18 = vsel %vm644_vm13, %v1086_v61, %v728_v16 }
 0x3d1   : > { %930 = vcosq.f32 %v731_v18 }
 0x3d2   : > { %932 = vsinq.f32 %v731_v18 }
 0x3db   : > { %v931_v22 = vpop.eup %930 }
 0x3dc   : > { %v933_v23 = vpop.eup %932  ;;  %v743_v24 = vxor.u32 2147483648, %v931_v22 }
 0x3dd   : > { %v740_v25 = vxor.u32 2147483648, %v933_v23 }
 0x3de   : > { %v744_v26 = vsel %vm742_vm14, %v743_v24, %v933_v23 }
 0x3df   : > { %v741_v5 = vsel %vm739_vm15, %v931_v22, %v740_v25 }
 0x3e0   : > { %v745_v27 = vsel %vm738_vm0, %v741_v5, %v744_v26 }
 0x3e1   : > { %v746_v28 = vsel %vm735_vm2, nan, %v745_v27 }
 0x3e2   : > { %748 = vst.msk [vmem:[%s361_s29] sm:$0x7] %vm747_vm1, %v746_v28 }
 0x3e3 PF: > { %s19_s11 = sadd.s32 1, %s956_s11   ;;  %s1130_s30 = smov %s952_s10 }
 0x3e4   : > { %p16_p5 = scmp.ge.s32.totalorder %s19_s11, 4   ;;  %s1131_s10 = smov %s1133_s12 }
 0x3e6   :  { %18 = sbr.rel (!%p16_p5) target bundleno = 2 (0x2), region = 86 }

</bundles_post_ra>
